<compile_context>
chip_gen: v7x
topology: tpu7x:2x2x1
jax: 0.10.0
libtpu: 0.0.40
codegen_flags: <defaults>
</compile_context>

<pallas_src>
import functools
import math

import jax
import jax.numpy as jnp
from jax.experimental import pallas as pl
from jax.experimental.pallas import tpu as pltpu


def _mha_pool_kernel(q_ref, k_ref, wq_ref, bq_ref, wkv_ref, bkv_ref,
                     seg_k_ref, seg_v_ref, out_ref, attn_ref,
                     *, n_head, d_k, d_v, hd_k_pad):
    tb = q_ref.shape[0]
    l = k_ref.shape[0] // tb
    hd_k = n_head * d_k
    hd_v = n_head * d_v
    w_dtype = wq_ref.dtype

    # ---- fused linear projections on the MXU (bf16/f32 inputs, f32 accum) ----
    qs = jnp.dot(q_ref[...].astype(w_dtype), wq_ref[...],
                 preferred_element_type=jnp.float32)
    qs = qs + bq_ref[...]                                       # (tb, H*dk) f32
    kv = jnp.dot(k_ref[...].astype(w_dtype), wkv_ref[...],
                 preferred_element_type=jnp.float32)
    kv = kv + bkv_ref[...]                                      # (tb*L, hd_k_pad + H*dv)

    ks = kv[:, :hd_k]                      # lane offset 0 -> no cross-lane relayout
    vs = kv[:, hd_k_pad:hd_k_pad + hd_v]   # 128-aligned lane offset (padded Wkv)

    # ---- per-head score reduction on the MXU (1/sqrt(d_k) folded into seg_k) ----
    # scores[b*L+j, h] = sum_d ks[b,j,h*dk+d] * qs[b,h*dk+d] / sqrt(dk)
    kq = (ks.reshape(tb, l, hd_k) * qs[:, None, :]).reshape(tb * l, hd_k)
    scores = jnp.dot(kq, seg_k_ref[...], preferred_element_type=jnp.float32)

    # ---- softmax over L with L on lanes (lane-dense max/exp/sum/reciprocal) ----
    scores = jnp.swapaxes(scores.reshape(tb, l, n_head), 1, 2)  # (tb, H, L)
    m = jnp.max(scores, axis=-1, keepdims=True)
    e = jnp.exp(scores - m)
    s = jnp.sum(e, axis=-1, keepdims=True)
    attn = e * pl.reciprocal(s, approx=True)                    # (tb, H, L)

    # ---- attn store: (H, tb, L) block, L on lanes, full-row dense stores ----
    # (static unroll over the tiny head dim is layout plumbing only; every
    #  store is a full lane-dense (tb, L) block, not a masked per-head write)
    for h in range(n_head):
        attn_ref[h] = attn[:, h, :].astype(attn_ref.dtype)

    # ---- attention-weighted value pooling ----
    attn2 = jnp.swapaxes(attn, 1, 2).reshape(tb * l, n_head)    # (tb*L, H)
    attn_exp = jnp.dot(attn2, seg_v_ref[...],
                       preferred_element_type=jnp.float32)      # (tb*L, H*dv)
    out = jnp.sum((attn_exp * vs).reshape(tb, l, hd_v), axis=1)  # (tb, H*dv)
    out_ref[...] = out.astype(out_ref.dtype)


def _choose_block_b(b, l, d_k_orig, hd_k, hd_k_pad, hd_v, small_vmem):
    """Pick the batch tile from the dominant per-batch-row f32 working set."""
    # k tile + fused kv + kq + attn_exp + weighted vs (per batch row, f32).
    bytes_per_row = 4 * l * (d_k_orig + (hd_k_pad + hd_v) + hd_k + 2 * hd_v + 8)
    tile_target = (5 if small_vmem else 16) * 2**20
    blk = tile_target // max(bytes_per_row, 1)
    # keep the kv-projection matmul's M (= tb*L) >= 256 to fill the MXU rows
    blk = max(blk, -(-256 // max(l, 1)))
    blk = max(8, min(512, blk))
    if small_vmem:
        # v7x (64 MiB/TC): keep >= 2 grid steps so both TensorCores get work.
        half8 = max(8, (((b + 1) // 2) // 8) * 8)
        blk = min(blk, half8)
    return b if blk >= b else max(8, (blk // 8) * 8)


def multihead_att_pool(q, k, wq, bq, wk, bk, wv, bv, *, n_head,
                       block_b=None, matmul_dtype=jnp.bfloat16):
    """Pallas TPU implementation of MultiheadAttPoolLayer.forward (eval mode).

    q: (B, Dq); k: (B, L, Dk). Weights are (in_features, out_features)
    (= torch weight.T); biases are (1, out_features).
    Returns (output (B, n_head*d_v) f32, attn (n_head*B, L) f32).
    matmul_dtype: dtype fed to the projection matmuls (bf16 recommended on
    v6e/v7x MXU); accumulation is always f32 and softmax/pooling stay f32.
    """
    b, d_q = q.shape
    _, l, d_k_orig = k.shape
    hd_k = wq.shape[1]
    hd_v = wv.shape[1]
    d_k = hd_k // n_head
    d_v = hd_v // n_head

    # Fused K/V projection weight with the K columns padded to a 128-lane
    # boundary so the in-kernel V slice starts at an aligned lane offset.
    hd_k_pad = -(-hd_k // 128) * 128
    pad = hd_k_pad - hd_k
    wkv = jnp.concatenate(
        [wk, jnp.zeros((d_k_orig, pad), wk.dtype), wv], axis=1).astype(matmul_dtype)
    bkv = jnp.concatenate(
        [bk, jnp.zeros((1, pad), bk.dtype), bv], axis=1).astype(jnp.float32)
    wq_c = wq.astype(matmul_dtype)
    bq_c = bq.astype(jnp.float32)

    # Head-segment (block-diagonal) matrices, built once and kept resident in
    # VMEM (grid-invariant index_map); 1/sqrt(d_k) is folded into seg_k.
    inv_temp = jnp.float32(1.0 / math.sqrt(d_k))
    seg_k = (jnp.arange(hd_k)[:, None] // d_k ==
             jnp.arange(n_head)[None, :]).astype(jnp.float32) * inv_temp
    seg_v = (jnp.arange(n_head)[:, None] ==
             jnp.arange(hd_v)[None, :] // d_v).astype(jnp.float32)

    # Flatten (B, L, Dk) -> (B*L, Dk) in HBM (free) so the kernel's projection
    # gets a clean 2-D tile with no in-kernel reshape of the input slab.
    k2 = k.reshape(b * l, d_k_orig)

    try:
        vmem_cap = pltpu.get_tpu_info().vmem_capacity_bytes
    except Exception:
        vmem_cap = 0  # unknown -> be conservative (treat like v7x)
    small_vmem = vmem_cap < 96 * 2**20

    if block_b is None:
        tb = _choose_block_b(b, l, d_k_orig, hd_k, hd_k_pad, hd_v, small_vmem)
    else:
        tb = min(block_b, b)
    tb = b if tb >= b else max(8, (tb // 8) * 8)
    grid = (pl.cdiv(b, tb),)

    kernel = functools.partial(_mha_pool_kernel, n_head=n_head, d_k=d_k,
                               d_v=d_v, hd_k_pad=hd_k_pad)

    # NOTE: on v7x, the resident weight/bias/seg inputs could additionally use
    # pipeline_mode=pl.Buffered(1) to avoid double-buffering grid-invariant
    # blocks; left at the default here since these weights are small.
    out, attn = pl.pallas_call(
        kernel,
        out_shape=(
            jax.ShapeDtypeStruct((b, hd_v), jnp.float32),
            jax.ShapeDtypeStruct((n_head, b, l), jnp.float32),
        ),
        grid=grid,
        in_specs=[
            pl.BlockSpec((tb, d_q), lambda i: (i, 0)),                    # q tile
            pl.BlockSpec((tb * l, d_k_orig), lambda i: (i, 0)),           # k tile (flat)
            pl.BlockSpec((d_q, hd_k), lambda i: (0, 0)),                  # Wq  (resident)
            pl.BlockSpec((1, hd_k), lambda i: (0, 0)),                    # bq  (resident)
            pl.BlockSpec((d_k_orig, hd_k_pad + hd_v), lambda i: (0, 0)),  # Wkv (resident)
            pl.BlockSpec((1, hd_k_pad + hd_v), lambda i: (0, 0)),         # bkv (resident)
            pl.BlockSpec((hd_k, n_head), lambda i: (0, 0)),               # seg_k (resident)
            pl.BlockSpec((n_head, hd_v), lambda i: (0, 0)),               # seg_v (resident)
        ],
        out_specs=(
            pl.BlockSpec((tb, hd_v), lambda i: (i, 0)),
            pl.BlockSpec((n_head, tb, l), lambda i: (0, i, 0)),
        ),
        compiler_params=pltpu.CompilerParams(
            dimension_semantics=("parallel",),
            vmem_limit_bytes=(32 if small_vmem else 64) * 1024 * 1024,
        ),
    )(q, k2, wq_c, bq_c, wkv, bkv, seg_k, seg_v)

    # attn is already head-major (n_head, B, L); the torch layout
    # (n_head*B, L) is a free contiguous reshape -- no HBM transpose.
    return out, attn.reshape(n_head * b, l)


def _reference(q, k, wq, bq, wk, bk, wv, bv, n_head):
    """Pure-JAX f32 reference mirroring the torch forward (eval mode)."""
    b, _ = q.shape
    _, l, d_k_orig = k.shape
    d_k = d_k_orig // n_head
    d_v = d_k
    qs = (q @ wq + bq[0]).reshape(b, n_head, d_k)
    ks = (k @ wk + bk[0]).reshape(b, l, n_head, d_k)
    vs = (k @ wv + bv[0]).reshape(b, l, n_head, d_v)
    qs = jnp.transpose(qs, (1, 0, 2)).reshape(n_head * b, d_k)
    ks = jnp.transpose(ks, (2, 0, 1, 3)).reshape(n_head * b, l, d_k)
    vs = jnp.transpose(vs, (2, 0, 1, 3)).reshape(n_head * b, l, d_v)
    attn = jnp.sum(qs[:, None, :] * ks, axis=2) / jnp.sqrt(jnp.float32(d_k))
    attn = jax.nn.softmax(attn, axis=1)
    out = jnp.sum(attn[:, :, None] * vs, axis=1)
    out = out.reshape(n_head, b, d_v)
    out = jnp.transpose(out, (1, 0, 2)).reshape(b, n_head * d_v)
    return out, attn


if __name__ == "__main__":
    # Small shapes consistent with the module's forward; B=16 with block_b=8
    # exercises a 2-step batch grid (pipelined DMA + resident weights).
    B, L = 16, 16
    D_Q_ORIG, D_K_ORIG = 32, 32
    N_HEAD = 4
    D_K = D_K_ORIG // N_HEAD
    D_V = D_K

    key = jax.random.PRNGKey(0)
    (k_q, k_k, k_wq, k_wk, k_wv, k_bq, k_bk, k_bv) = jax.random.split(key, 8)

    q = jax.random.normal(k_q, (B, D_Q_ORIG), dtype=jnp.float32)
    k = jax.random.normal(k_k, (B, L, D_K_ORIG), dtype=jnp.float32)

    # Deterministic parameter init mirroring the module's __init__ stds.
    # Weights stored as (in_features, out_features) = torch_weight.T
    std_q = math.sqrt(2.0 / (D_Q_ORIG + D_K))
    std_k = math.sqrt(2.0 / (D_K_ORIG + D_K))
    std_v = math.sqrt(2.0 / (D_K_ORIG + D_V))
    wq = std_q * jax.random.normal(k_wq, (D_Q_ORIG, N_HEAD * D_K), dtype=jnp.float32)
    wk = std_k * jax.random.normal(k_wk, (D_K_ORIG, N_HEAD * D_K), dtype=jnp.float32)
    wv = std_v * jax.random.normal(k_wv, (D_K_ORIG, N_HEAD * D_V), dtype=jnp.float32)
    bq = 0.1 * jax.random.normal(k_bq, (1, N_HEAD * D_K), dtype=jnp.float32)
    bk = 0.1 * jax.random.normal(k_bk, (1, N_HEAD * D_K), dtype=jnp.float32)
    bv = 0.1 * jax.random.normal(k_bv, (1, N_HEAD * D_V), dtype=jnp.float32)

    out_ref, attn_ref = _reference(q, k, wq, bq, wk, bk, wv, bv, N_HEAD)

    # 1) Exact-precision path (f32 matmul inputs, auto tile size); tolerance
    #    only has to cover the approximate EUP reciprocal in the softmax.
    out32, attn32 = multihead_att_pool(q, k, wq, bq, wk, bk, wv, bv,
                                       n_head=N_HEAD, matmul_dtype=jnp.float32)
    jax.block_until_ready(out32)
    jax.block_until_ready(attn32)
    assert out32.shape == (B, N_HEAD * D_V)
    assert attn32.shape == (N_HEAD * B, L)
    assert jnp.allclose(out32, out_ref, atol=2e-3, rtol=2e-3)
    assert jnp.allclose(attn32, attn_ref, atol=2e-3, rtol=2e-3)

    # 2) Fast path (default): bf16 projection matmul inputs (v6e/v7x MXU),
    #    f32 accumulation; forced block_b=8 exercises the multi-step grid.
    out16, attn16 = multihead_att_pool(q, k, wq, bq, wk, bk, wv, bv,
                                       n_head=N_HEAD, block_b=8)
    jax.block_until_ready(out16)
    jax.block_until_ready(attn16)
    assert out16.shape == (B, N_HEAD * D_V)
    assert attn16.shape == (N_HEAD * B, L)
    # Looser tolerance: bf16 rounding of q/k/W feeds the softmax exponentials.
    assert jnp.allclose(out16, out_ref, atol=5e-2, rtol=5e-2)
    assert jnp.allclose(attn16, attn_ref, atol=5e-2, rtol=5e-2)

    print("KERNEL_OK")
</pallas_src>

<mosaic_0001>
module attributes {stable_mosaic.version = 11 : i64} {
  func.func @_mha_pool_kernel(%arg0: i32, %arg1: memref<8x32xf32, #tpu.memory_space<vmem>>, %arg2: memref<128x32xf32, #tpu.memory_space<vmem>>, %arg3: memref<32x32xf32, #tpu.memory_space<vmem>>, %arg4: memref<1x32xf32, #tpu.memory_space<vmem>>, %arg5: memref<32x160xf32, #tpu.memory_space<vmem>>, %arg6: memref<1x160xf32, #tpu.memory_space<vmem>>, %arg7: memref<32x4xf32, #tpu.memory_space<vmem>>, %arg8: memref<4x32xf32, #tpu.memory_space<vmem>>, %arg9: memref<8x32xf32, #tpu.memory_space<vmem>>, %arg10: memref<4x8x16xf32, #tpu.memory_space<vmem>>) attributes {dimension_semantics = [#tpu.dimension_semantics<parallel>], iteration_bounds = array<i64: 2>, scalar_prefetch = 0 : i64, scratch_operands = 0 : i64, tpu.core_type = #tpu.core_type<tc>, window_params = [{transform_indices = @transform_0, window_bounds = array<i64: 8, 32>}, {transform_indices = @transform_1, window_bounds = array<i64: 128, 32>}, {pipeline_mode = #tpu.pipeline_mode<synchronous>, transform_indices = @transform_2, window_bounds = array<i64: 32, 32>}, {pipeline_mode = #tpu.pipeline_mode<synchronous>, transform_indices = @transform_3, window_bounds = array<i64: 1, 32>}, {pipeline_mode = #tpu.pipeline_mode<synchronous>, transform_indices = @transform_4, window_bounds = array<i64: 32, 160>}, {pipeline_mode = #tpu.pipeline_mode<synchronous>, transform_indices = @transform_5, window_bounds = array<i64: 1, 160>}, {pipeline_mode = #tpu.pipeline_mode<synchronous>, transform_indices = @transform_6, window_bounds = array<i64: 32, 4>}, {pipeline_mode = #tpu.pipeline_mode<synchronous>, transform_indices = @transform_7, window_bounds = array<i64: 4, 32>}, {transform_indices = @transform_8, window_bounds = array<i64: 8, 32>}, {transform_indices = @transform_9, window_bounds = array<i64: 4, 8, 16>}]} {
    %c0 = arith.constant 0 : index
    %c0_0 = arith.constant 0 : index
    %0 = vector.load %arg1[%c0, %c0_0] : memref<8x32xf32, #tpu.memory_space<vmem>>, vector<8x32xf32>
    %c0_1 = arith.constant 0 : index
    %c0_2 = arith.constant 0 : index
    %1 = vector.load %arg3[%c0_1, %c0_2] : memref<32x32xf32, #tpu.memory_space<vmem>>, vector<32x32xf32>
    %cst = arith.constant dense<0.000000e+00> : vector<8x32xf32>
    %2 = tpu.matmul %0, %1, %cst {dimension_numbers = #tpu.dot_dimension_numbers<[1], [0], [0], [1], [0, 0, 1, 1], [], []>} : vector<8x32xf32>, vector<32x32xf32>, vector<8x32xf32> -> vector<8x32xf32>
    %c0_3 = arith.constant 0 : index
    %c0_4 = arith.constant 0 : index
    %3 = vector.load %arg4[%c0_3, %c0_4] : memref<1x32xf32, #tpu.memory_space<vmem>>, vector<1x32xf32>
    %4 = vector.broadcast %3 : vector<1x32xf32> to vector<8x32xf32>
    %5 = arith.addf %2, %4 : vector<8x32xf32>
    %c0_5 = arith.constant 0 : index
    %c0_6 = arith.constant 0 : index
    %6 = vector.load %arg2[%c0_5, %c0_6] : memref<128x32xf32, #tpu.memory_space<vmem>>, vector<128x32xf32>
    %c0_7 = arith.constant 0 : index
    %c0_8 = arith.constant 0 : index
    %7 = vector.load %arg5[%c0_7, %c0_8] : memref<32x160xf32, #tpu.memory_space<vmem>>, vector<32x160xf32>
    %cst_9 = arith.constant dense<0.000000e+00> : vector<128x160xf32>
    %8 = tpu.matmul %6, %7, %cst_9 {dimension_numbers = #tpu.dot_dimension_numbers<[1], [0], [0], [1], [0, 0, 1, 1], [], []>} : vector<128x32xf32>, vector<32x160xf32>, vector<128x160xf32> -> vector<128x160xf32>
    %c0_10 = arith.constant 0 : index
    %c0_11 = arith.constant 0 : index
    %9 = vector.load %arg6[%c0_10, %c0_11] : memref<1x160xf32, #tpu.memory_space<vmem>>, vector<1x160xf32>
    %10 = vector.broadcast %9 : vector<1x160xf32> to vector<128x160xf32>
    %11 = arith.addf %8, %10 : vector<128x160xf32>
    %12 = vector.extract_strided_slice %11 {offsets = [0, 0], sizes = [128, 32], strides = [1, 1]} : vector<128x160xf32> to vector<128x32xf32>
    %13 = vector.extract_strided_slice %11 {offsets = [0, 128], sizes = [128, 32], strides = [1, 1]} : vector<128x160xf32> to vector<128x32xf32>
    %14 = vector.shape_cast %12 : vector<128x32xf32> to vector<8x16x32xf32>
    %15 = vector.shape_cast %5 : vector<8x32xf32> to vector<8x1x32xf32>
    %16 = vector.broadcast %15 : vector<8x1x32xf32> to vector<8x16x32xf32>
    %17 = arith.mulf %14, %16 : vector<8x16x32xf32>
    %18 = vector.shape_cast %17 : vector<8x16x32xf32> to vector<128x32xf32>
    %c0_12 = arith.constant 0 : index
    %c0_13 = arith.constant 0 : index
    %19 = vector.load %arg7[%c0_12, %c0_13] : memref<32x4xf32, #tpu.memory_space<vmem>>, vector<32x4xf32>
    %cst_14 = arith.constant dense<0.000000e+00> : vector<128x4xf32>
    %20 = tpu.matmul %18, %19, %cst_14 {dimension_numbers = #tpu.dot_dimension_numbers<[1], [0], [0], [1], [0, 0, 1, 1], [], []>} : vector<128x32xf32>, vector<32x4xf32>, vector<128x4xf32> -> vector<128x4xf32>
    %21 = vector.shape_cast %20 : vector<128x4xf32> to vector<8x16x4xf32>
    %22 = tpu.transpose %21, [0, 2, 1] : vector<8x16x4xf32> -> vector<8x4x16xf32>
    %cst_15 = arith.constant dense<0xFF800000> : vector<8x4xf32>
    %23 = vector.multi_reduction <maximumf>, %22, %cst_15 [2] : vector<8x4x16xf32> to vector<8x4xf32>
    %24 = vector.shape_cast %23 : vector<8x4xf32> to vector<8x4x1xf32>
    %25 = vector.broadcast %24 : vector<8x4x1xf32> to vector<8x4x16xf32>
    %26 = arith.subf %22, %25 : vector<8x4x16xf32>
    %27 = math.exp %26 : vector<8x4x16xf32>
    %cst_16 = arith.constant dense<0.000000e+00> : vector<8x4xf32>
    %28 = vector.multi_reduction <add>, %27, %cst_16 [2] : vector<8x4x16xf32> to vector<8x4xf32>
    %29 = vector.shape_cast %28 : vector<8x4xf32> to vector<8x4x1xf32>
    %30 = tpu.reciprocal %29 {approx = true} : vector<8x4x1xf32> -> vector<8x4x1xf32>
    %31 = vector.broadcast %30 : vector<8x4x1xf32> to vector<8x4x16xf32>
    %32 = arith.mulf %27, %31 : vector<8x4x16xf32>
    %33 = vector.extract_strided_slice %32 {offsets = [0, 0, 0], sizes = [8, 1, 16], strides = [1, 1, 1]} : vector<8x4x16xf32> to vector<8x1x16xf32>
    %34 = vector.shape_cast %33 : vector<8x1x16xf32> to vector<8x16xf32>
    %c0_17 = arith.constant 0 : index
    %c0_18 = arith.constant 0 : index
    %c0_19 = arith.constant 0 : index
    %35 = vector.load %arg10[%c0_17, %c0_18, %c0_19] : memref<4x8x16xf32, #tpu.memory_space<vmem>>, vector<1x8x16xf32>
    %36 = vector.shape_cast %35 : vector<1x8x16xf32> to vector<8x16xf32>
    %37 = vector.shape_cast %34 : vector<8x16xf32> to vector<1x8x16xf32>
    tpu.vector_store %arg10[%c0_17, %c0_18, %c0_19], %37 {strides = array<i32>} : memref<4x8x16xf32, #tpu.memory_space<vmem>>, vector<1x8x16xf32>,
    %38 = vector.extract_strided_slice %32 {offsets = [0, 1, 0], sizes = [8, 1, 16], strides = [1, 1, 1]} : vector<8x4x16xf32> to vector<8x1x16xf32>
    %39 = vector.shape_cast %38 : vector<8x1x16xf32> to vector<8x16xf32>
    %c1 = arith.constant 1 : index
    %c0_20 = arith.constant 0 : index
    %c0_21 = arith.constant 0 : index
    %40 = vector.load %arg10[%c1, %c0_20, %c0_21] : memref<4x8x16xf32, #tpu.memory_space<vmem>>, vector<1x8x16xf32>
    %41 = vector.shape_cast %40 : vector<1x8x16xf32> to vector<8x16xf32>
    %42 = vector.shape_cast %39 : vector<8x16xf32> to vector<1x8x16xf32>
    tpu.vector_store %arg10[%c1, %c0_20, %c0_21], %42 {strides = array<i32>} : memref<4x8x16xf32, #tpu.memory_space<vmem>>, vector<1x8x16xf32>,
    %43 = vector.extract_strided_slice %32 {offsets = [0, 2, 0], sizes = [8, 1, 16], strides = [1, 1, 1]} : vector<8x4x16xf32> to vector<8x1x16xf32>
    %44 = vector.shape_cast %43 : vector<8x1x16xf32> to vector<8x16xf32>
    %c2 = arith.constant 2 : index
    %c0_22 = arith.constant 0 : index
    %c0_23 = arith.constant 0 : index
    %45 = vector.load %arg10[%c2, %c0_22, %c0_23] : memref<4x8x16xf32, #tpu.memory_space<vmem>>, vector<1x8x16xf32>
    %46 = vector.shape_cast %45 : vector<1x8x16xf32> to vector<8x16xf32>
    %47 = vector.shape_cast %44 : vector<8x16xf32> to vector<1x8x16xf32>
    tpu.vector_store %arg10[%c2, %c0_22, %c0_23], %47 {strides = array<i32>} : memref<4x8x16xf32, #tpu.memory_space<vmem>>, vector<1x8x16xf32>,
    %48 = vector.extract_strided_slice %32 {offsets = [0, 3, 0], sizes = [8, 1, 16], strides = [1, 1, 1]} : vector<8x4x16xf32> to vector<8x1x16xf32>
    %49 = vector.shape_cast %48 : vector<8x1x16xf32> to vector<8x16xf32>
    %c3 = arith.constant 3 : index
    %c0_24 = arith.constant 0 : index
    %c0_25 = arith.constant 0 : index
    %50 = vector.load %arg10[%c3, %c0_24, %c0_25] : memref<4x8x16xf32, #tpu.memory_space<vmem>>, vector<1x8x16xf32>
    %51 = vector.shape_cast %50 : vector<1x8x16xf32> to vector<8x16xf32>
    %52 = vector.shape_cast %49 : vector<8x16xf32> to vector<1x8x16xf32>
    tpu.vector_store %arg10[%c3, %c0_24, %c0_25], %52 {strides = array<i32>} : memref<4x8x16xf32, #tpu.memory_space<vmem>>, vector<1x8x16xf32>,
    %53 = tpu.transpose %32, [0, 2, 1] : vector<8x4x16xf32> -> vector<8x16x4xf32>
    %54 = vector.shape_cast %53 : vector<8x16x4xf32> to vector<128x4xf32>
    %c0_26 = arith.constant 0 : index
    %c0_27 = arith.constant 0 : index
    %55 = vector.load %arg8[%c0_26, %c0_27] : memref<4x32xf32, #tpu.memory_space<vmem>>, vector<4x32xf32>
    %cst_28 = arith.constant dense<0.000000e+00> : vector<128x32xf32>
    %56 = tpu.matmul %54, %55, %cst_28 {dimension_numbers = #tpu.dot_dimension_numbers<[1], [0], [0], [1], [0, 0, 1, 1], [], []>} : vector<128x4xf32>, vector<4x32xf32>, vector<128x32xf32> -> vector<128x32xf32>
    %57 = arith.mulf %56, %13 : vector<128x32xf32>
    %58 = vector.shape_cast %57 : vector<128x32xf32> to vector<8x16x32xf32>
    %cst_29 = arith.constant dense<0.000000e+00> : vector<8x32xf32>
    %59 = vector.multi_reduction <add>, %58, %cst_29 [1] : vector<8x16x32xf32> to vector<8x32xf32>
    %c0_30 = arith.constant 0 : index
    %c0_31 = arith.constant 0 : index
    %60 = vector.load %arg9[%c0_30, %c0_31] : memref<8x32xf32, #tpu.memory_space<vmem>>, vector<8x32xf32>
    tpu.vector_store %arg9[%c0_30, %c0_31], %59 {strides = array<i32>} : memref<8x32xf32, #tpu.memory_space<vmem>>, vector<8x32xf32>,
    return
  }
  func.func @transform_0(%arg0: i32) -> (i32, i32) {
    %c0_i32 = arith.constant 0 : i32
    %c0_i32_0 = arith.constant 0 : i32
    return %arg0, %c0_i32 : i32, i32
  }
  func.func @transform_1(%arg0: i32) -> (i32, i32) {
    %c0_i32 = arith.constant 0 : i32
    %c0_i32_0 = arith.constant 0 : i32
    return %arg0, %c0_i32 : i32, i32
  }
  func.func @transform_2(%arg0: i32) -> (i32, i32) {
    %c0_i32 = arith.constant 0 : i32
    %c0_i32_0 = arith.constant 0 : i32
    %c0_i32_1 = arith.constant 0 : i32
    return %c0_i32, %c0_i32_0 : i32, i32
  }
  func.func @transform_3(%arg0: i32) -> (i32, i32) {
    %c0_i32 = arith.constant 0 : i32
    %c0_i32_0 = arith.constant 0 : i32
    %c0_i32_1 = arith.constant 0 : i32
    return %c0_i32, %c0_i32_0 : i32, i32
  }
  func.func @transform_4(%arg0: i32) -> (i32, i32) {
    %c0_i32 = arith.constant 0 : i32
    %c0_i32_0 = arith.constant 0 : i32
    %c0_i32_1 = arith.constant 0 : i32
    return %c0_i32, %c0_i32_0 : i32, i32
  }
  func.func @transform_5(%arg0: i32) -> (i32, i32) {
    %c0_i32 = arith.constant 0 : i32
    %c0_i32_0 = arith.constant 0 : i32
    %c0_i32_1 = arith.constant 0 : i32
    return %c0_i32, %c0_i32_0 : i32, i32
  }
  func.func @transform_6(%arg0: i32) -> (i32, i32) {
    %c0_i32 = arith.constant 0 : i32
    %c0_i32_0 = arith.constant 0 : i32
    %c0_i32_1 = arith.constant 0 : i32
    return %c0_i32, %c0_i32_0 : i32, i32
  }
  func.func @transform_7(%arg0: i32) -> (i32, i32) {
    %c0_i32 = arith.constant 0 : i32
    %c0_i32_0 = arith.constant 0 : i32
    %c0_i32_1 = arith.constant 0 : i32
    return %c0_i32, %c0_i32_0 : i32, i32
  }
  func.func @transform_8(%arg0: i32) -> (i32, i32) {
    %c0_i32 = arith.constant 0 : i32
    %c0_i32_0 = arith.constant 0 : i32
    return %arg0, %c0_i32 : i32, i32
  }
  func.func @transform_9(%arg0: i32) -> (i32, i32, i32) {
    %c0_i32 = arith.constant 0 : i32
    %c0_i32_0 = arith.constant 0 : i32
    %c0_i32_1 = arith.constant 0 : i32
    return %c0_i32, %arg0, %c0_i32_0 : i32, i32, i32
  }
}

</mosaic_0001>

<bundles_post_ra>
// kernel: tpu_custom_call.1
= control target key start
LH: loop header
LB: loop body
LE: loop exit
PB: predicated region body
PF: predicated region fallthrough
CT: control target
= control target key end

     0   :  { %15 = vsyncpa [#allocation3], 0  ;;  %s3039_s0 = inlined_call_operand.vmem [shape: f32[16,32], index: 0, kind: input, shape index: {}]   ;;  %s3040_s1 = inlined_call_operand.vmem [shape: f32[256,32], index: 1, kind: input, shape index: {}]   ;;  %s3041_s2 = inlined_call_operand.vmem [shape: f32[32,32], index: 2, kind: input, shape index: {}]   ;;  %s3042_s3 = inlined_call_operand.vmem [shape: f32[1,32], index: 3, kind: input, shape index: {}]   ;;  %s3043_s4 = inlined_call_operand.vmem [shape: f32[32,160], index: 4, kind: input, shape index: {}]   ;;  %s3044_s5 = inlined_call_operand.vmem [shape: f32[1,160], index: 5, kind: input, shape index: {}]   ;;  %s3045_s6 = inlined_call_operand.vmem [shape: f32[32,4], index: 6, kind: input, shape index: {}]   ;;  %s3046_s7 = inlined_call_operand.vmem [shape: f32[4,32], index: 7, kind: input, shape index: {}]   ;;  %s3047_s8 = inlined_call_operand.hbm [shape: f32[16,32], index: 8, kind: output, shape index: {0}]   ;;  %s3048_s9 = inlined_call_operand.hbm [shape: f32[4,16,16], index: 9, kind: output, shape index: {1}]  }
   0x1   :  { %17 = vsyncpa [#allocation3 + $0x1], 0 }
   0x2   :  { %18 = vsyncpa [#allocation5], 0 }
   0x3   :  { %20 = vsyncpa [#allocation5 + $0x1], 0  ;;  %s2555_s30 = smov 0   ;;  %s2557_s10 = smov 0  }
   0x4   :  { %s2559_s11 = smov 0   ;;  %s2561_s12 = smov 0  }
   0x5 LB: > { %s2576_s13 = sadd.s32 4294967295, %s2494_s12   ;;  %s2108_s14 = sadd.s32 4294967294, %s2494_s12   ;;  %s2494_s12 = sphi %s2561_s12, %s3057_s12   ;;  %s2490_s11 = sphi %s2559_s11, %s3056_s11   ;;  %s2486_s10 = sphi %s2557_s10, %s3055_s10   ;;  %s2482_s30 = sphi %s2555_s30, %s3054_s30  }
   0x6   : > { %s2580_s15 = sadd.s32 1, %s2494_s12   ;;  %s211_s16 = sadd.s32 1, %s2490_s11 }
   0x7   : > { %s208_s17 = ssub.s32 %s2494_s12, %s2580_s15  ;;  %p221_p0 = scmp.ne.s32.totalorder %s2490_s11, %s2486_s10 }
   0x8   : > { %p209_p1 = scmp.eq.s32.totalorder %s208_s17, 0  ;;  %p222_p2 = scmp.eq.s32.totalorder %s2576_s13, 1 }
   0x9   : > { %p227_p3 = scmp.ne.s32.totalorder %s2486_s10, %s2482_s30  ;;  %p228_p4 = scmp.eq.s32.totalorder %s2108_s14, 1 }
   0xa   : > { %s2591_s18 = scalar_select %p209_p1, %s2490_s11, %s211_s16  }
   0xb   : > { %p2593_p5 = por %p222_p2, %p221_p0  ;;  %p2597_p6 = por %p228_p4, %p227_p3 }
   0xc   : > { %p2111_p7 = scmp.ge.s32.totalorder %s2494_s12, 1  ;;  %p306_p8 = scmp.lt.s32.totalorder %s2494_s12, 3 }
   0xe   : > { %p307_p9 = pnand %p2111_p7, %p306_p8 }
   0xf   : > { %v362_v0 = vld [vmem:[%s3041_s2] sm:$0xff] (!%p307_p9)  ;;  %v363_v1 = vld [vmem:[%s3041_s2 + $0x8] sm:$0xff] (!%p307_p9)  ;;  %v2496_v3 = vmov (!%p307_p9), 0.0|0.0   ;;  %v466_v5 = vld [vmem:[%s3043_s4 + $0x18] sm:$0xff] (!%p307_p9)  ;;  %vm2497_vm0 = vmmov (!%p307_p9), 0   ;;  %v2498_v8 = vmov (!%p307_p9), 0.0   ;;  %v473_v37 = vlaneseq (!%p307_p9) }
  0x10   : > { %310 = sbr.rel (%p307_p9) target bundleno = 1339 (0x53b), region = 52  ;;  %v464_v2 = vld [vmem:[%s3043_s4 + $0x8] sm:$0xff] (!%p307_p9)  ;;  %2291 = vmatprep.subr.bf16.mxu0 (!%p307_p9), %v2496_v3  ;;  %v2292_v4 = vpack.c.bf16 (!%p307_p9), %v363_v1, %v362_v0  ;;  %v463_v6 = vld [vmem:[%s3043_s4] sm:$0xff] (!%p307_p9)  ;;  %v465_v7 = vld [vmem:[%s3043_s4 + $0x10] sm:$0xff] (!%p307_p9)  ;;  %2230 = vmatprep.mubr.msk.f32.mxu0 (!%p307_p9), %vm2497_vm0, %v2498_v8  ;;  %p351_p10 = scmp.lt.s32.totalorder (!%p307_p9), %s2576_s13, 1  ;;  %vm373_vm1 = vcmask (!%p307_p9), 261120  }
  0x11   : > { %s2115_s21 = sshll.u32 (!%p307_p9), %s2576_s13, 4  ;;  %v2297_v9 = vpack.c.bf16 (!%p307_p9), %v466_v5, %v464_v2  ;;  %v2299_v10 = vpack.c.bf16 (!%p307_p9), %v465_v7, %v463_v6  ;;  %v364_v11 = vld [vmem:[%s3041_s2 + $0x10] sm:$0xff] (!%p307_p9)  ;;  %v365_v12 = vld [vmem:[%s3041_s2 + $0x18] sm:$0xff] (!%p307_p9)  ;;  %v468_v13 = vld [vmem:[%s3043_s4 + $0x28] sm:$0xff] (!%p307_p9)  ;;  %595 = vmatprep.mubr.f32.mxu1 (!%p307_p9), %v2498_v8  ;;  %v474_v38 = vshrl.u32 (!%p307_p9), %v473_v37, 7  ;;  %vm1251_vm2 = vcmask (!%p307_p9), 125952  }
  0x12   : > { %p356_p11 = scmp.lt.s32.totalorder (!%p307_p9), %s2115_s21, 31  ;;  %2293 = vmatpush3.bf16.msra.mxu0 (!%p307_p9), %v2292_v4  ;;  %v2295_v14 = vpack.c.bf16 (!%p307_p9), %v365_v12, %v364_v11  ;;  %v470_v15 = vld [vmem:[%s3043_s4 + $0x38] sm:$0xff] (!%p307_p9)  ;;  %v467_v16 = vld [vmem:[%s3043_s4 + $0x20] sm:$0xff] (!%p307_p9)  ;;  %v469_v17 = vld [vmem:[%s3043_s4 + $0x30] sm:$0xff] (!%p307_p9)  ;;  %v2499_v48 = vmov (!%p307_p9), 1966171168  }
  0x13   : > { %2298 = vmatprep.subr.bf16.mxu1 (!%p307_p9), %v2297_v9  ;;  %2294 = vmatprep.subr.bf16.mxu0 (!%p307_p9), %v2496_v3  ;;  %v2301_v18 = vpack.c.bf16 (!%p307_p9), %v470_v15, %v468_v13  ;;  %v2303_v19 = vpack.c.bf16 (!%p307_p9), %v469_v17, %v467_v16  ;;  %v471_v39 = vld [vmem:[%s3044_s5] sm:$0x3] (!%p307_p9)  ;;  %v479_v40 = vsub.s32 (!%p307_p9), 1, %v474_v38  ;;  %v799_v43 = vld [vmem:[%s3045_s6 + $0x8] sm:$0xff] (!%p307_p9)  ;;  %v800_v45 = vld [vmem:[%s3045_s6 + $0x10] sm:$0xff] (!%p307_p9)  ;;  %v695_v49 = vunpack.c.l.s4 (!%p307_p9), %v2499_v48  ;;  %s2855_s22 = sand.u32 (!%p307_p9), 1, %s2486_s10  }
  0x14   : > { %2300 = vmatpush1.bf16.msra.mxu1 (!%p307_p9), %v2299_v10  ;;  %v798_v42 = vld [vmem:[%s3045_s6] sm:$0xff] (!%p307_p9)  ;;  %v801_v46 = vld [vmem:[%s3045_s6 + $0x18] sm:$0xff] (!%p307_p9)  ;;  %v2722_v52 = vsub.s32 (!%p307_p9), 0, %v474_v38  ;;  %vm1717_vm3 = vcmask (!%p307_p9), 1043456   ;;  %vm1358_vm4 = vcmask (!%p307_p9), 1044484   ;;  %vm1361_vm5 = vcmask (!%p307_p9), 1045509  }
  0x15   : > { %2302 = vmatprep.subr.bf16.mxu1 (!%p307_p9), %v2301_v18  ;;  %v2705_v41 = vrot.slane (!%p307_p9), %v471_v39, %v479_v40  ;;  %v2305_v44 = vpack.c.bf16 (!%p307_p9), %v799_v43, %v798_v42  ;;  %v2309_v47 = vpack.c.bf16 (!%p307_p9), %v801_v46, %v800_v45  ;;  %v696_v50 = vunpack.c.0.s8 (!%p307_p9), %v695_v49  ;;  %v2117_v51 = vld [vmem:[%s3042_s3] ss:$0 sm:$0xff] (!%p307_p9)  ;;  %s3049_s25 = sshll.u32 (!%p307_p9), %s2576_s13, 7 }
  0x16   : > { %2296 = vmatpush3.bf16.msra.mxu0 (!%p307_p9), %v2295_v14  ;;  %v2727_v58 = vrot.slane (!%p307_p9), %v471_v39, %v2722_v52  ;;  %vm1364_vm6 = vcmask (!%p307_p9), 1046534   ;;  %vm1367_vm7 = vcmask (!%p307_p9), 1047559   ;;  %vm1407_vm8 = vcmask (!%p307_p9), 130051  }
  0x17   : > { %s352_s23 = scalar_select %p351_p10, %s2576_s13, 1  ;;  %2306 = vmatprep.subr.bf16.mxu0 %v2305_v44  ;;  %v2724_v53 = vsub.s32 %v696_v50, %v474_v38  ;;  %vm1355_vm9 = vcmask 1043459   ;;  %vm1394_vm10 = vcmask 130050   ;;  %vm1352_vm11 = vcmask 1042434  }
  0x18   : > { %s3059_s21 = smov (!%p356_p11, %s2115_s21), 31  ;;  %2304 = vmatpush1.bf16.msra.mxu1 %v2303_v19  ;;  %vm1381_vm12 = vcmask 130049   ;;  %vm1349_vm13 = vcmask 1041409   ;;  %vm1370_vm14 = vcmask 130048   ;;  %vm1383_vm15 = vcmask 122880  }
  0x19   : > { %s2114_s24 = sshll.u32 %s352_s23, 3  ;;  %s2116_s28 = sshll.u32 %s3059_s21, 3  ;;  %2313 = vmatprep.subr.bf16.mxu1 %v2305_v44  ;;  %vm1396_vm0 = vcmask 123904  }
  0x1a   : > { %s354_s27 = scalar_lea.vmem %s3039_s0, %s2114_s24  ;;  %s2652_s16 = scalar_lea.vmem %s3040_s1, %s2116_s28 }
  0x1b   : > { %v361_v20 = vld [vmem:[%s354_s27] sm:$0xff]  ;;  %v448_v22 = vld [vmem:[%s2652_s16 + $0x8] sm:$0xff]  ;;  %v449_v23 = vld [vmem:[%s2652_s16 + $0x10] sm:$0xff]  ;;  %s2113_s23 = sshll.u32 %s2855_s22, 5  ;;  %s2921_s28 = scalar_lea.hbm %s3048_s9, %s3049_s25 }
  0x1c   : > { %v447_v21 = vld [vmem:[%s2652_s16] sm:$0xff]  ;;  %2231 = vmatmul.mubr.msk.f32.vlgmr.msra.gmra.mrb[0].mxu0 %vm373_vm1, %v361_v20  ;;  %v450_v24 = vld [vmem:[%s2652_s16 + $0x18] sm:$0xff]  ;;  %v452_v26 = vld [vmem:[%s2652_s16 + $0x28] sm:$0xff]  ;;  %s2863_s24 = scalar_lea.vmem [#allocation4], %s2113_s23  ;;  %s2500_s21 = smov [#allocation4]  }
  0x1d   : > { %2119 = vmatmul.mubr.msk.f32.vlgmr.msra.gmra.mrb[0].mxu1 %vm373_vm1, %v447_v21  ;;  %v451_v25 = vld [vmem:[%s2652_s16 + $0x20] sm:$0xff]  ;;  %v453_v27 = vld [vmem:[%s2652_s16 + $0x30] sm:$0xff]  ;;  %v454_v28 = vld [vmem:[%s2652_s16 + $0x38] sm:$0xff]  ;;  %2308 = vmatpush3.bf16.msra.mxu0 %v2305_v44  ;;  %s2002_s29 = sshll.u32 %s2863_s24, 4  ;;  %s2404_s17 = sshll.u32 %s2500_s21, 4  ;;  %s2924_s29 = int_to_ptr.vmem [resolvable:$true] %s2002_s29  ;;  %s2405_s17 = int_to_ptr.vmem [resolvable:$false] %s2404_s17 }
  0x1e   : > { %601 = vmatprep.mubr.f32.mxu1 %v2498_v8  ;;  %v455_v29 = vld [vmem:[%s2652_s16 + $0x40] sm:$0xff]  ;;  %v456_v30 = vld [vmem:[%s2652_s16 + $0x48] sm:$0xff]  ;;  %v457_v31 = vld [vmem:[%s2652_s16 + $0x50] sm:$0xff]  ;;  %2315 = vmatpush3.bf16.msra.mxu1 %v2305_v44  ;;  %s2406_s23 = scalar_lea.vmem %s2405_s17, 1024  ;;  %p2407_p1 = scmp.lt.s32.totalorder %s2924_s29, %s2405_s17 }
  0x1f   : > { %v458_v32 = vld [vmem:[%s2652_s16 + $0x58] sm:$0xff]  ;;  %v459_v33 = vld [vmem:[%s2652_s16 + $0x60] sm:$0xff]  ;;  %v460_v34 = vld [vmem:[%s2652_s16 + $0x68] sm:$0xff]  ;;  %2310 = vmatprep.subr.bf16.mxu0 %v2309_v47  ;;  %2314 = vmatprep.subr.bf16.mxu1 %v2309_v47 }
  0x20   : > { %v461_v35 = vld [vmem:[%s2652_s16 + $0x70] sm:$0xff]  ;;  %v462_v36 = vld [vmem:[%s2652_s16 + $0x78] sm:$0xff]  ;;  %s2400_s16 = scalar_lea.vmem %s2924_s29, 512 }
  0x21   : > { %2120 = vmatmul.mubr.msk.f32.gmra.mrb[2].mxu1 %vm373_vm1, %v448_v22  ;;  %2312 = vmatpush3.bf16.msra.mxu0 %v2309_v47  ;;  %p2401_p12 = scmp.ne.s32.totalorder %s2924_s29, %s2400_s16  ;;  %p2408_p2 = scmp.lt.s32.totalorder %s2406_s23, %s2400_s16 }
  0x22   : > { %607 = vmatprep.mubr.f32.mxu1 %v2498_v8  ;;  %2316 = vmatpush3.bf16.msra.mxu1 %v2309_v47 }
  0x23   : > { %p2402_p13 = pnand %p2401_p12, %p2593_p5  ;;  %p2409_p3 = por %p2408_p2, %p2407_p1 }
  0x25   : > { %2121 = vmatmul.mubr.msk.f32.gmra.mrb[4].mxu1 %vm373_vm1, %v449_v23  ;;  %p2403_p0 = pneg %p2402_p13 }
  0x26   : > { %613 = vmatprep.mubr.f32.mxu1 %v2498_v8 }
  0x27   : > { %p2410_p4 = pnand %p2409_p3, %p2403_p0 }
  0x29   : > { %2122 = vmatmul.mubr.msk.f32.gmra.mrb[6].mxu1 %vm373_vm1, %v450_v24 }
  0x2a   : > { %619 = vmatprep.mubr.f32.mxu1 %v2498_v8 }
  0x2d   : > { %2123 = vmatmul.mubr.msk.f32.gmra.mrb[8].mxu1 %vm373_vm1, %v451_v25 }
  0x2e   : > { %625 = vmatprep.mubr.f32.mxu1 %v2498_v8 }
  0x31   : > { %2124 = vmatmul.mubr.msk.f32.gmra.mrb[10].mxu1 %vm373_vm1, %v452_v26 }
  0x32   : > { %631 = vmatprep.mubr.f32.mxu1 %v2498_v8 }
  0x35   : > { %2125 = vmatmul.mubr.msk.f32.gmra.mrb[12].mxu1 %vm373_vm1, %v453_v27 }
  0x36   : > { %637 = vmatprep.mubr.f32.mxu1 %v2498_v8 }
  0x39   : > { %2126 = vmatmul.mubr.msk.f32.gmra.mrb[14].mxu1 %vm373_vm1, %v454_v28 }
  0x3a   : > { %643 = vmatprep.mubr.f32.mxu1 %v2498_v8 }
  0x3d   : > { %2127 = vmatmul.mubr.msk.f32.gmra.mrb[16].mxu1 %vm373_vm1, %v455_v29 }
  0x3e   : > { %649 = vmatprep.mubr.f32.mxu1 %v2498_v8 }
  0x41   : > { %2128 = vmatmul.mubr.msk.f32.gmra.mrb[18].mxu1 %vm373_vm1, %v456_v30 }
  0x42   : > { %655 = vmatprep.mubr.f32.mxu1 %v2498_v8 }
  0x45   : > { %2129 = vmatmul.mubr.msk.f32.gmra.mrb[20].mxu1 %vm373_vm1, %v457_v31 }
  0x46   : > { %661 = vmatprep.mubr.f32.mxu1 %v2498_v8 }
  0x49   : > { %2130 = vmatmul.mubr.msk.f32.gmra.mrb[22].mxu1 %vm373_vm1, %v458_v32 }
  0x4a   : > { %667 = vmatprep.mubr.f32.mxu1 %v2498_v8 }
  0x4d   : > { %2131 = vmatmul.mubr.msk.f32.gmra.mrb[24].mxu1 %vm373_vm1, %v459_v33 }
  0x4e   : > { %673 = vmatprep.mubr.f32.mxu1 %v2498_v8 }
  0x51   : > { %2132 = vmatmul.mubr.msk.f32.gmra.mrb[26].mxu1 %vm373_vm1, %v460_v34 }
  0x52   : > { %679 = vmatprep.mubr.f32.mxu1 %v2498_v8 }
  0x55   : > { %2133 = vmatmul.mubr.msk.f32.gmra.mrb[28].mxu1 %vm373_vm1, %v461_v35 }
  0x56   : > { %685 = vmatprep.mubr.f32.mxu1 %v2498_v8 }
  0x59   : > { %2134 = vmatmul.mubr.msk.f32.gmra.mrb[30].mxu1 %vm373_vm1, %v462_v36 }
  0xef   : > { %v443_v54 = vpop.f32.mrb[0].mxu0 }
  0xf0   : > { %v444_v55 = vadd.f32 %v2117_v51, %v443_v54  ;;  %v2232_v56 = vpop.f32.mrb[1].mxu0  ;;  %v597_v57 = vpop.f32.mrb[0].mxu1 }
  0xf1   : > { %v599_v60 = vpop.f32.mrb[1].mxu1  ;;  %v598_v1 = vadd.f32 %v597_v57, %v2727_v58 }
  0xf2   : > { %v700_v59 = vrot.slane %v444_v55, %v2724_v53  ;;  %v2731_v61 = vadd.f32 %v599_v60, %v2705_v41  ;;  %v693_v29 = vcombine.high %v444_v55, %v444_v55 }
  0xf4   : > { %v708_v62 = vcombine.high %v700_v59, %v700_v59  ;;  %v716_v63 = vrot.slane %v700_v59, %v2724_v53  ;;  %v603_v0 = vpop.f32.mrb[2].mxu1  ;;  %v707_v36 = vrot.slane %v693_v29, %v2724_v53 }
  0xf5   : > { %v604_v3 = vadd.f32 %v603_v0, %v2727_v58  ;;  %v605_v4 = vpop.f32.mrb[3].mxu1 }
  0xf6   : > { %v745_v2 = vrot.slane %v716_v63, %v2722_v52  ;;  %v730_v5 = vrot.slane %v708_v62, %v2724_v53  ;;  %v2739_v6 = vadd.f32 %v605_v4, %v2705_v41  ;;  %v738_v15 = vcombine.high %v716_v63, %v716_v63 }
  0xf7   : > { %v723_v45 = vrot.slane %v707_v36, %v2724_v53  ;;  %v709_v49 = vcombine.high %v707_v36, %v707_v36 }
  0xf8   : > { %v782_v7 = vmul.f32 %v745_v2, %v598_v1  ;;  %v783_v8 = vmul.f32 %v745_v2, %v604_v3  ;;  %v749_v9 = vrot.slane %v730_v5, %v2722_v52  ;;  %v609_v10 = vpop.f32.mrb[4].mxu1  ;;  %v753_v21 = vrot.slane %v738_v15, %v2722_v52 }
  0xf9   : > { %v610_v11 = vadd.f32 %v609_v10, %v2727_v58  ;;  %v611_v12 = vpop.f32.mrb[5].mxu1  ;;  %v740_v27 = vcombine.high %v730_v5, %v730_v5  ;;  %v761_v51 = vrot.slane %v723_v45, %v2722_v52  ;;  %v737_v62 = vrot.slane %v709_v49, %v2724_v53 }
  0xfa   : > { %2241 = vmatprep.mubr.msk.f32.mxu0 %vm373_vm1, %v782_v7  ;;  %v2745_v13 = vadd.f32 %v611_v12, %v2705_v41  ;;  %v739_v10 = vcombine.high %v723_v45, %v723_v45 }
  0xfb   : > { %2242 = vmatmul.mubr.msk.f32.vlgmr.msra.gmra.mrb[2].mxu0 %vm373_vm1, %v783_v8  ;;  %v784_v14 = vmul.f32 %v749_v9, %v610_v11  ;;  %v757_v34 = vrot.slane %v740_v27, %v2722_v52  ;;  %v765_v3 = vrot.slane %v737_v62, %v2722_v52 }
  0xfc   : > { %v615_v16 = vpop.f32.mrb[6].mxu1 }
  0xfd   : > { %v616_v17 = vadd.f32 %v615_v16, %v2727_v58  ;;  %v617_v18 = vpop.f32.mrb[7].mxu1  ;;  %2244 = vmatprep.mubr.msk.f32.mxu0 %vm373_vm1, %v784_v14  ;;  %v769_v16 = vrot.slane %v739_v10, %v2722_v52 }
  0xfe   : > { %v2751_v19 = vadd.f32 %v617_v18, %v2705_v41 }
  0xff   : > { %v785_v20 = vmul.f32 %v749_v9, %v616_v17 }
 0x100   : > { %v621_v22 = vpop.f32.mrb[8].mxu1 }
 0x101   : > { %v622_v23 = vadd.f32 %v621_v22, %v2727_v58  ;;  %v623_v24 = vpop.f32.mrb[9].mxu1  ;;  %2245 = vmatmul.mubr.msk.f32.gmra.mrb[4].mxu0 %vm373_vm1, %v785_v20 }
 0x102   : > { %v2757_v25 = vadd.f32 %v623_v24, %v2705_v41  ;;  %v741_v24 = vcombine.high %v737_v62, %v737_v62 }
 0x103   : > { %v786_v26 = vmul.f32 %v753_v21, %v622_v23 }
 0x104   : > { %v627_v28 = vpop.f32.mrb[10].mxu1 }
 0x105   : > { %v628_v30 = vadd.f32 %v627_v28, %v2727_v58  ;;  %v629_v31 = vpop.f32.mrb[11].mxu1  ;;  %2247 = vmatprep.mubr.msk.f32.mxu0 %vm373_vm1, %v786_v26 }
 0x106   : > { %v2762_v32 = vadd.f32 %v629_v31, %v2705_v41 }
 0x107   : > { %v787_v33 = vmul.f32 %v753_v21, %v628_v30  ;;  %v773_v30 = vrot.slane %v741_v24, %v2722_v52 }
 0x108   : > { %v633_v35 = vpop.f32.mrb[12].mxu1 }
 0x109   : > { %v634_v37 = vadd.f32 %v633_v35, %v2727_v58  ;;  %v635_v38 = vpop.f32.mrb[13].mxu1  ;;  %2248 = vmatmul.mubr.msk.f32.gmra.mrb[6].mxu0 %vm373_vm1, %v787_v33 }
 0x10a   : > { %v2769_v39 = vadd.f32 %v635_v38, %v2705_v41 }
 0x10b   : > { %v788_v40 = vmul.f32 %v757_v34, %v634_v37 }
 0x10c   : > { %v639_v42 = vpop.f32.mrb[14].mxu1 }
 0x10d   : > { %v640_v43 = vadd.f32 %v639_v42, %v2727_v58  ;;  %v641_v44 = vpop.f32.mrb[15].mxu1  ;;  %2250 = vmatprep.mubr.msk.f32.mxu0 %vm373_vm1, %v788_v40 }
 0x10e   : > { %v2775_v46 = vadd.f32 %v641_v44, %v2705_v41 }
 0x10f   : > { %v789_v47 = vmul.f32 %v757_v34, %v640_v43 }
 0x110   : > { %v645_v48 = vpop.f32.mrb[16].mxu1 }
 0x111   : > { %v646_v50 = vadd.f32 %v645_v48, %v2727_v58  ;;  %v647_v54 = vpop.f32.mrb[17].mxu1  ;;  %2251 = vmatmul.mubr.msk.f32.gmra.mrb[8].mxu0 %vm373_vm1, %v789_v47 }
 0x112   : > { %v2781_v55 = vadd.f32 %v647_v54, %v2705_v41 }
 0x113   : > { %v790_v56 = vmul.f32 %v761_v51, %v646_v50 }
 0x114   : > { %v651_v57 = vpop.f32.mrb[18].mxu1 }
 0x115   : > { %v652_v59 = vadd.f32 %v651_v57, %v2727_v58  ;;  %v653_v60 = vpop.f32.mrb[19].mxu1  ;;  %2253 = vmatprep.mubr.msk.f32.mxu0 %vm373_vm1, %v790_v56 }
 0x116   : > { %v2787_v63 = vadd.f32 %v653_v60, %v2705_v41 }
 0x117   : > { %v791_v0 = vmul.f32 %v761_v51, %v652_v59 }
 0x118   : > { %v657_v1 = vpop.f32.mrb[20].mxu1 }
 0x119   : > { %v658_v2 = vadd.f32 %v657_v1, %v2727_v58  ;;  %v659_v4 = vpop.f32.mrb[21].mxu1  ;;  %2254 = vmatmul.mubr.msk.f32.gmra.mrb[10].mxu0 %vm373_vm1, %v791_v0 }
 0x11a   : > { %v2793_v5 = vadd.f32 %v659_v4, %v2705_v41 }
 0x11b   : > { %v792_v7 = vmul.f32 %v765_v3, %v658_v2 }
 0x11c   : > { %v663_v8 = vpop.f32.mrb[22].mxu1 }
 0x11d   : > { %v664_v9 = vadd.f32 %v663_v8, %v2727_v58  ;;  %v665_v53 = vpop.f32.mrb[23].mxu1  ;;  %2256 = vmatprep.mubr.msk.f32.mxu0 %vm373_vm1, %v792_v7 }
 0x11e   : > { %v2798_v11 = vadd.f32 %v665_v53, %v2705_v41 }
 0x11f   : > { %v793_v12 = vmul.f32 %v765_v3, %v664_v9 }
 0x120   : > { %v669_v14 = vpop.f32.mrb[24].mxu1 }
 0x121   : > { %v670_v15 = vadd.f32 %v669_v14, %v2727_v58  ;;  %v671_v17 = vpop.f32.mrb[25].mxu1  ;;  %2257 = vmatmul.mubr.msk.f32.gmra.mrb[12].mxu0 %vm373_vm1, %v793_v12 }
 0x122   : > { %v2804_v18 = vadd.f32 %v671_v17, %v2705_v41 }
 0x123   : > { %v794_v20 = vmul.f32 %v769_v16, %v670_v15 }
 0x124   : > { %v675_v21 = vpop.f32.mrb[26].mxu1 }
 0x125   : > { %v676_v22 = vadd.f32 %v675_v21, %v2727_v58  ;;  %v677_v23 = vpop.f32.mrb[27].mxu1  ;;  %2259 = vmatprep.mubr.msk.f32.mxu0 %vm373_vm1, %v794_v20 }
 0x126   : > { %v2809_v26 = vadd.f32 %v677_v23, %v2705_v41 }
 0x127   : > { %v795_v27 = vmul.f32 %v769_v16, %v676_v22 }
 0x128   : > { %v681_v28 = vpop.f32.mrb[28].mxu1 }
 0x129   : > { %v682_v29 = vadd.f32 %v681_v28, %v2727_v58  ;;  %v683_v31 = vpop.f32.mrb[29].mxu1  ;;  %2260 = vmatmul.mubr.msk.f32.gmra.mrb[14].mxu0 %vm373_vm1, %v795_v27 }
 0x12a   : > { %v2815_v33 = vadd.f32 %v683_v31, %v2705_v41 }
 0x12b   : > { %v796_v34 = vmul.f32 %v773_v30, %v682_v29 }
 0x12c   : > { %v687_v35 = vpop.f32.mrb[30].mxu1 }
 0x12d   : > { %v688_v36 = vadd.f32 %v687_v35, %v2727_v58  ;;  %v689_v37 = vpop.f32.mrb[31].mxu1  ;;  %2262 = vmatprep.mubr.msk.f32.mxu1 %vm373_vm1, %v796_v34 }
 0x12e   : > { %v2820_v38 = vadd.f32 %v689_v37, %v2705_v41 }
 0x12f   : > { %v797_v40 = vmul.f32 %v773_v30, %v688_v36 }
 0x131   : > { %2263 = vmatmul.mubr.msk.f32.vlgmr.msra.gmra.mrb[32].mxu1 %vm373_vm1, %v797_v40 }
 0x1ce   : > { %v2243_v52 = vpop.f32.mrb[2].mxu0 }
 0x1cf   : > { %v916_v42 = vpop.f32.mrb[3].mxu0 }
 0x1d0   : > { %995 = vxpose.xlu0.b32.start [1/2] (short) (narrow) %v916_v42, 8 }
 0x1d4   : > { %996 = vxpose.xlu0.b32.end [2/2] (short) (narrow) %v2243_v52, 8  ;;  %v2246_v43 = vpop.f32.mrb[4].mxu0 }
 0x1d5   : > { %v926_v44 = vpop.f32.mrb[5].mxu0 }
 0x1d6   : > { %1027 = vxpose.xlu1.b32.start [1/2] (short) (narrow) %v926_v44, 8 }
 0x1da   : > { %1028 = vxpose.xlu1.b32.end [2/2] (short) (narrow) %v2246_v43, 8 }
 0x1dc   : > { %v2249_v45 = vpop.f32.mrb[6].mxu0 }
 0x1dd   : > { %v936_v47 = vpop.f32.mrb[7].mxu0 }
 0x1de   : > { %1059 = vxpose.xlu0.b32.start [1/2] (short) (narrow) %v936_v47, 8 }
 0x1e2   : > { %1060 = vxpose.xlu0.b32.end [2/2] (short) (narrow) %v2249_v45, 8 }
 0x1e4   : > { %v2252_v58 = vpop.f32.mrb[8].mxu0 }
 0x1e5   : > { %v946_v48 = vpop.f32.mrb[9].mxu0 }
 0x1e6   : > { %1091 = vxpose.xlu1.b32.start [1/2] (short) (narrow) %v946_v48, 8 }
 0x1ea   : > { %1092 = vxpose.xlu1.b32.end [2/2] (short) (narrow) %v2252_v58, 8 }
 0x1ec   : > { %v2255_v41 = vpop.f32.mrb[10].mxu0 }
 0x1ed   : > { %v956_v49 = vpop.f32.mrb[11].mxu0 }
 0x1ee   : > { %1123 = vxpose.xlu0.b32.start [1/2] (short) (narrow) %v956_v49, 8 }
 0x1f2   : > { %1124 = vxpose.xlu0.b32.end [2/2] (short) (narrow) %v2255_v41, 8 }
 0x1f4   : > { %v2258_v50 = vpop.f32.mrb[12].mxu0 }
 0x1f5   : > { %v966_v51 = vpop.f32.mrb[13].mxu0 }
 0x1f6   : > { %1155 = vxpose.xlu1.b32.start [1/2] (short) (narrow) %v966_v51, 8 }
 0x1fa   : > { %1156 = vxpose.xlu1.b32.end [2/2] (short) (narrow) %v2258_v50, 8 }
 0x1fc   : > { %v2261_v54 = vpop.f32.mrb[14].mxu0 }
 0x1fd   : > { %v976_v56 = vpop.f32.mrb[15].mxu0 }
 0x1fe   : > { %1187 = vxpose.xlu0.b32.start [1/2] (short) (narrow) %v976_v56, 8 }
 0x202   : > { %1188 = vxpose.xlu0.b32.end [2/2] (short) (narrow) %v2261_v54, 8 }
 0x204   : > { %v2264_v57 = vpop.f32.mrb[32].mxu1 }
 0x205   : > { %v986_v59 = vpop.f32.mrb[33].mxu1 }
 0x206   : > { %1219 = vxpose.xlu1.b32.start [1/2] (short) (narrow) %v986_v59, 8 }
 0x20a   : > { %1220 = vxpose.xlu1.b32.end [2/2] (short) (narrow) %v2264_v57, 8 }
 0x250   : > { %v1011_v60 = vpop.trf.xlu0 }
 0x251   : > { %v1252_v62 = vsel %vm1251_vm2, %v1011_v60, -inf }
 0x252   : > { %1253 = vmax.xlane.f32.xlu0 %v1252_v62 }
 0x256   : > { %v1043_v0 = vpop.trf.xlu1 }
 0x257   : > { %v1255_v1 = vsel %vm1251_vm2, %v1043_v0, -inf }
 0x258   : > { %1256 = vmax.xlane.f32.xlu1 %v1255_v1 }
 0x25e   : > { %v1075_v2 = vpop.trf.xlu0 }
 0x25f   : > { %v1258_v3 = vsel %vm1251_vm2, %v1075_v2, -inf }
 0x260   : > { %1259 = vmax.xlane.f32.xlu1 %v1258_v3 }
 0x266   : > { %v1107_v4 = vpop.trf.xlu1 }
 0x267   : > { %v1261_v7 = vsel %vm1251_vm2, %v1107_v4, -inf }
 0x268   : > { %1262 = vmax.xlane.f32.xlu1 %v1261_v7 }
 0x26e   : > { %v1139_v8 = vpop.trf.xlu0 }
 0x26f   : > { %v1264_v9 = vsel %vm1251_vm2, %v1139_v8, -inf }
 0x270   : > { %1265 = vmax.xlane.f32.xlu0 %v1264_v9 }
 0x276   : > { %v1171_v53 = vpop.trf.xlu1 }
 0x277   : > { %v1267_v10 = vsel %vm1251_vm2, %v1171_v53, -inf }
 0x278   : > { %1268 = vmax.xlane.f32.xlu1 %v1267_v10 }
 0x27e   : > { %v1203_v12 = vpop.trf.xlu0 }
 0x27f   : > { %v1270_v14 = vsel %vm1251_vm2, %v1203_v12, -inf }
 0x280   : > { %1271 = vmax.xlane.f32.xlu0 %v1270_v14 }
 0x286   : > { %v1235_v15 = vpop.trf.xlu1 }
 0x287   : > { %v1273_v16 = vsel %vm1251_vm2, %v1235_v15, -inf }
 0x288   : > { %1274 = vmax.xlane.f32.xlu1 %v1273_v16 }
 0x2df   : > { %v1254_v17 = vpop.xlane.xlu0 %1253 }
 0x2e0   : > { %v1276_v20 = vsub.f32 %v1011_v60, %v1254_v17 }
 0x2e2   : > { %v1284_v21 = vmul.f32 1.442695, %v1276_v20 }
 0x2e4   : > { %2368 = vpow2.f32 %v1284_v21 }
 0x2e5   : > { %v1257_v22 = vpop.xlane.xlu1 %1256 }
 0x2e6   : > { %v1277_v23 = vsub.f32 %v1043_v0, %v1257_v22 }
 0x2e8   : > { %v1286_v24 = vmul.f32 1.442695, %v1277_v23 }
 0x2ea   : > { %2370 = vpow2.f32 %v1286_v24 }
 0x2ed   : > { %v1260_v28 = vpop.xlane.xlu1 %1259 }
 0x2ee   : > { %v2369_v27 = vpop.eup %2368  ;;  %v1278_v29 = vsub.f32 %v1075_v2, %v1260_v28 }
 0x2ef   : > { %v1300_v30 = vsel %vm1251_vm2, %v2369_v27, 0.0 }
 0x2f0   : > { %1301 = vadd.xlane.f32.xlu0 %v1300_v30  ;;  %v1288_v31 = vmul.f32 1.442695, %v1278_v29 }
 0x2f2   : > { %2372 = vpow2.f32 %v1288_v31 }
 0x2f4   : > { %v2371_v34 = vpop.eup %2370 }
 0x2f5   : > { %v1263_v35 = vpop.xlane.xlu1 %1262  ;;  %v1303_v36 = vsel %vm1251_vm2, %v2371_v34, 0.0 }
 0x2f6   : > { %v1279_v37 = vsub.f32 %v1107_v4, %v1263_v35  ;;  %1304 = vadd.xlane.f32.xlu1 %v1303_v36 }
 0x2f8   : > { %v1290_v40 = vmul.f32 1.442695, %v1279_v37 }
 0x2fa   : > { %2374 = vpow2.f32 %v1290_v40 }
 0x2fc   : > { %v2373_v52 = vpop.eup %2372 }
 0x2fd   : > { %v1266_v42 = vpop.xlane.xlu0 %1265  ;;  %v1306_v43 = vsel %vm1251_vm2, %v2373_v52, 0.0 }
 0x2fe   : > { %v1280_v44 = vsub.f32 %v1139_v8, %v1266_v42  ;;  %1307 = vadd.xlane.f32.xlu0 %v1306_v43 }
 0x300   : > { %v1292_v45 = vmul.f32 1.442695, %v1280_v44 }
 0x302   : > { %2376 = vpow2.f32 %v1292_v45 }
 0x304   : > { %v2375_v47 = vpop.eup %2374 }
 0x305   : > { %v1269_v58 = vpop.xlane.xlu1 %1268  ;;  %v1309_v48 = vsel %vm1251_vm2, %v2375_v47, 0.0 }
 0x306   : > { %v1281_v41 = vsub.f32 %v1171_v53, %v1269_v58  ;;  %1310 = vadd.xlane.f32.xlu1 %v1309_v48 }
 0x308   : > { %v1294_v49 = vmul.f32 1.442695, %v1281_v41 }
 0x30a   : > { %2378 = vpow2.f32 %v1294_v49 }
 0x30c   : > { %v2377_v50 = vpop.eup %2376 }
 0x30d   : > { %v1272_v51 = vpop.xlane.xlu0 %1271  ;;  %v1312_v54 = vsel %vm1251_vm2, %v2377_v50, 0.0 }
 0x30e   : > { %v1282_v56 = vsub.f32 %v1203_v12, %v1272_v51  ;;  %1313 = vadd.xlane.f32.xlu0 %v1312_v54  ;;  %v1667_v12 = vld [vmem:[%s3046_s7] sm:$0xf] }
 0x30f   : > { %2265 = vmatprep.subr.msk.mxu0 %vm1717_vm3, %v1667_v12 }
 0x310   : > { %v1296_v57 = vmul.f32 1.442695, %v1282_v56  ;;  %2266 = vmatpush3.msk.msra.mxu0 %vm1717_vm3, %v1667_v12  ;;  %vm1668_vm3 = vcmask 31744  }
 0x312   : > { %2380 = vpow2.f32 %v1296_v57 }
 0x314   : > { %v2836_v59 = vpop.eup %2378 }
 0x315   : > { %v1275_v60 = vpop.xlane.xlu1 %1274  ;;  %v1315_v62 = vsel %vm1251_vm2, %v2836_v59, 0.0 }
 0x316   : > { %v1283_v0 = vsub.f32 %v1235_v15, %v1275_v60  ;;  %1316 = vadd.xlane.f32.xlu1 %v1315_v62 }
 0x318   : > { %v1298_v1 = vmul.f32 1.442695, %v1283_v0 }
 0x31a   : > { %2382 = vpow2.f32 %v1298_v1 }
 0x31c   : > { %v2840_v2 = vpop.eup %2380 }
 0x31d   : > { %v1318_v3 = vsel %vm1251_vm2, %v2840_v2, 0.0 }
 0x31e   : > { %1319 = vadd.xlane.f32.xlu0 %v1318_v3 }
 0x324   : > { %v2844_v4 = vpop.eup %2382 }
 0x325   : > { %v1321_v7 = vsel %vm1251_vm2, %v2844_v4, 0.0  ;;  %vm1409_vm2 = vcmask 124928  }
 0x326   : > { %1322 = vadd.xlane.f32.xlu1 %v1321_v7 }
 0x37d   : > { %v1302_v8 = vpop.xlane.xlu0 %1301 }
 0x37e   : > { %2384 = vrcp.f32 %v1302_v8 }
 0x383   : > { %v1305_v9 = vpop.xlane.xlu1 %1304 }
 0x384   : > { %2386 = vrcp.f32 %v1305_v9 }
 0x388   : > { %v2385_v53 = vpop.eup %2384 }
 0x389   : > { %v2848_v10 = vmul.f32 %v2385_v53, %v2369_v27 }
 0x38b   : > { %1411 = vxpose.xlu0.b32.start.end [1/1] (short) (narrow) %v2848_v10, 16  ;;  %v1308_v14 = vpop.xlane.xlu0 %1307 }
 0x38c   : > { %2388 = vrcp.f32 %v1308_v14 }
 0x38e   : > { %v2387_v15 = vpop.eup %2386 }
 0x38f   : > { %v1333_v16 = vmul.f32 %v2387_v15, %v2371_v34 }
 0x391   : > { %1443 = vxpose.xlu1.b32.start.end [1/1] (short) (narrow) %v1333_v16, 16  ;;  %v1348_v28 = vrot.slane %v1333_v16, 7 }
 0x393   : > { %v1311_v17 = vpop.xlane.xlu1 %1310  ;;  %v1398_v35 = vsel %vm1358_vm4, %v1348_v28, %v2848_v10  ;;  %v1385_v44 = vsel %vm1355_vm9, %v1348_v28, %v2848_v10  ;;  %v1372_v54 = vsel %vm1352_vm11, %v1348_v28, %v2848_v10  ;;  %v1350_v3 = vsel %vm1349_vm13, %v1348_v28, %v2848_v10 }
 0x394   : > { %2390 = vrcp.f32 %v1311_v17 }
 0x396   : > { %v2389_v20 = vpop.eup %2388 }
 0x397   : > { %v1334_v21 = vmul.f32 %v2389_v20, %v2373_v52 }
 0x399   : > { %1475 = vxpose.xlu0.b32.start.end [1/1] (short) (narrow) %v1334_v21, 16  ;;  %v1351_v29 = vrot.slane %v1334_v21, 6 }
 0x39b   : > { %v1314_v22 = vpop.xlane.xlu0 %1313  ;;  %v1399_v36 = vsel %vm1361_vm5, %v1351_v29, %v1398_v35  ;;  %v1373_v56 = vsel %vm1355_vm9, %v1351_v29, %v1372_v54  ;;  %v1353_v8 = vsel %vm1352_vm11, %v1351_v29, %v1350_v3 }
 0x39c   : > { %2392 = vrcp.f32 %v1314_v22 }
 0x39e   : > { %v2391_v23 = vpop.eup %2390 }
 0x39f   : > { %v1335_v24 = vmul.f32 %v2391_v23, %v2375_v47  ;;  %v1386_v47 = vsel %vm1358_vm4, %v1351_v29, %v1385_v44 }
 0x3a1   : > { %1507 = vxpose.xlu0.b32.start.end [1/1] (short) (narrow) %v1335_v24, 16  ;;  %v1354_v31 = vrot.slane %v1335_v24, 5 }
 0x3a3   : > { %v1317_v27 = vpop.xlane.xlu1 %1316  ;;  %v1400_v40 = vsel %vm1364_vm6, %v1354_v31, %v1399_v36  ;;  %v1387_v58 = vsel %vm1361_vm5, %v1354_v31, %v1386_v47 }
 0x3a4   : > { %2394 = vrcp.f32 %v1317_v27 }
 0x3a6   : > { %v2393_v30 = vpop.eup %2392 }
 0x3a7   : > { %v1336_v34 = vmul.f32 %v2393_v30, %v2377_v50 }
 0x3a9   : > { %1539 = vxpose.xlu1.b32.start.end [1/1] (short) (narrow) %v1336_v34, 16  ;;  %v1357_v37 = vrot.slane %v1336_v34, 4 }
 0x3ab   : > { %v1401_v52 = vsel %vm1367_vm7, %v1357_v37, %v1400_v40  ;;  %v1320_v42 = vpop.xlane.xlu0 %1319  ;;  %v1388_v41 = vsel %vm1364_vm6, %v1357_v37, %v1387_v58 }
 0x3ac   : > { %2396 = vrcp.f32 %v1320_v42  ;;  %2155 = vst.msk [vmem:[%s2863_s24 + $0x15] sm:$0xf8] %vm1407_vm8, %v1401_v52 }
 0x3ae   : > { %v2395_v43 = vpop.eup %2394 }
 0x3af   : > { %v1337_v45 = vmul.f32 %v2395_v43, %v2836_v59  ;;  %v1374_v59 = vsel %vm1358_vm4, %v1354_v31, %v1373_v56 }
 0x3b0   : > { %v1375_v60 = vsel %vm1361_vm5, %v1357_v37, %v1374_v59 }
 0x3b1   : > { %v1360_v48 = vrot.slane %v1337_v45, 3  ;;  %1571 = vxpose.xlu0.b32.start.end [1/1] (short) (narrow) %v1337_v45, 16 }
 0x3b3   : > { %v1389_v49 = vsel %vm1367_vm7, %v1360_v48, %v1388_v41  ;;  %v1323_v50 = vpop.xlane.xlu1 %1322  ;;  %v1376_v0 = vsel %vm1364_vm6, %v1360_v48, %v1375_v60 }
 0x3b4   : > { %2398 = vrcp.f32 %v1323_v50  ;;  %2153 = vst.msk [vmem:[%s2863_s24 + $0xe] sm:$0xfc] %vm1394_vm10, %v1389_v49 }
 0x3b6   : > { %v2397_v51 = vpop.eup %2396 }
 0x3b7   : > { %v1338_v57 = vmul.f32 %v2397_v51, %v2840_v2  ;;  %v1356_v2 = vsel %vm1355_vm9, %v1354_v31, %v1353_v8 }
 0x3b8   : > { %v1359_v53 = vsel %vm1358_vm4, %v1357_v37, %v1356_v2 }
 0x3b9   : > { %1603 = vxpose.xlu1.b32.start.end [1/1] (short) (narrow) %v1338_v57, 16  ;;  %v1363_v62 = vrot.slane %v1338_v57, 2  ;;  %v1362_v12 = vsel %vm1361_vm5, %v1360_v48, %v1359_v53 }
 0x3bb   : > { %v1377_v1 = vsel %vm1367_vm7, %v1363_v62, %v1376_v0  ;;  %v1365_v10 = vsel %vm1364_vm6, %v1363_v62, %v1362_v12  ;;  %v1402_v15 = vsel %vm1349_vm13, %v1363_v62, %v1360_v48 }
 0x3bc   : > { %2151 = vst.msk [vmem:[%s2863_s24 + $0x7] sm:$0xfe] %vm1381_vm12, %v1377_v1 }
 0x3be   : > { %v2399_v7 = vpop.eup %2398 }
 0x3bf   : > { %v1339_v9 = vmul.f32 %v2399_v7, %v2844_v4 }
 0x3c1   : > { %v1366_v14 = vrot.slane %v1339_v9, 1  ;;  %1635 = vxpose.xlu0.b32.start.end [1/1] (short) (narrow) %v1339_v9, 16 }
 0x3c3   : > { %v1368_v16 = vsel %vm1367_vm7, %v1366_v14, %v1365_v10  ;;  %v1390_v4 = vsel %vm1349_vm13, %v1366_v14, %v1363_v62  ;;  %v1403_v17 = vsel %vm1352_vm11, %v1366_v14, %v1402_v15  ;;  %2152 = vst.msk [vmem:[%s2863_s24 + $0xf] sm:$0x1] %vm1383_vm15, %v1366_v14 }
 0x3c4   : > { %1371 = vst.msk [vmem:[%s2863_s24] sm:$0xff] %vm1370_vm14, %v1368_v16 }
 0x3c5   : > { %2154 = vst.msk [vmem:[%s2863_s24 + $0x16] sm:$0x3] %vm1396_vm0, %v1390_v4 }
 0x3c6   : > { %2156 = vst.msk [vmem:[%s2863_s24 + $0x1d] sm:$0x7] %vm1409_vm2, %v1403_v17 }
 0x40b   : > { %v1427_v20 = vpop.trf.xlu0 }
 0x40c   : > { %2267 = vmatprep.mubr.msk.f32.mxu0 %vm1668_vm3, %v1427_v20 }
 0x40f   : > { %v1428_v21 = vpop.trf.xlu0 }
 0x410   : > { %2268 = vmatmul.mubr.msk.f32.vlgmr.msra.gmra.mrb[16].mxu0 %vm1668_vm3, %v1428_v21 }
 0x411   : > { %v1459_v22 = vpop.trf.xlu1 }
 0x412   : > { %2270 = vmatprep.mubr.msk.f32.mxu0 %vm1668_vm3, %v1459_v22 }
 0x415   : > { %v1460_v23 = vpop.trf.xlu1 }
 0x416   : > { %2271 = vmatmul.mubr.msk.f32.gmra.mrb[18].mxu0 %vm1668_vm3, %v1460_v23 }
 0x419   : > { %v1491_v24 = vpop.trf.xlu0 }
 0x41a   : > { %2273 = vmatprep.mubr.msk.f32.mxu0 %vm1668_vm3, %v1491_v24 }
 0x41d   : > { %v1492_v27 = vpop.trf.xlu0 }
 0x41e   : > { %2274 = vmatmul.mubr.msk.f32.gmra.mrb[20].mxu0 %vm1668_vm3, %v1492_v27 }
 0x421   : > { %v1523_v28 = vpop.trf.xlu0 }
 0x422   : > { %2276 = vmatprep.mubr.msk.f32.mxu0 %vm1668_vm3, %v1523_v28 }
 0x425   : > { %v1524_v29 = vpop.trf.xlu0 }
 0x426   : > { %2277 = vmatmul.mubr.msk.f32.gmra.mrb[22].mxu0 %vm1668_vm3, %v1524_v29 }
 0x429   : > { %v1555_v30 = vpop.trf.xlu1 }
 0x42a   : > { %2279 = vmatprep.mubr.msk.f32.mxu0 %vm1668_vm3, %v1555_v30 }
 0x42d   : > { %v1556_v31 = vpop.trf.xlu1 }
 0x42e   : > { %2280 = vmatmul.mubr.msk.f32.gmra.mrb[24].mxu0 %vm1668_vm3, %v1556_v31 }
 0x431   : > { %v1587_v34 = vpop.trf.xlu0 }
 0x432   : > { %2282 = vmatprep.mubr.msk.f32.mxu0 %vm1668_vm3, %v1587_v34 }
 0x435   : > { %v1588_v35 = vpop.trf.xlu0 }
 0x436   : > { %2283 = vmatmul.mubr.msk.f32.gmra.mrb[26].mxu0 %vm1668_vm3, %v1588_v35 }
 0x439   : > { %v1619_v36 = vpop.trf.xlu1 }
 0x43a   : > { %2285 = vmatprep.mubr.msk.f32.mxu0 %vm1668_vm3, %v1619_v36 }
 0x43d   : > { %v1620_v37 = vpop.trf.xlu1 }
 0x43e   : > { %2286 = vmatmul.mubr.msk.f32.gmra.mrb[28].mxu0 %vm1668_vm3, %v1620_v37 }
 0x441   : > { %v1651_v40 = vpop.trf.xlu0 }
 0x442   : > { %2288 = vmatprep.mubr.msk.f32.mxu0 %vm1668_vm3, %v1651_v40 }
 0x445   : > { %v1652_v52 = vpop.trf.xlu0 }
 0x446   : > { %2289 = vmatmul.mubr.msk.f32.gmra.mrb[30].mxu0 %vm1668_vm3, %v1652_v52 }
 0x447   : > { %2413 = shalt.err (!%p2410_p4)
}
 0x448   : > { %s2414_s24 = scalar_lea.hbm %s2921_s28, 512  ;;  %s2418_s21 = scalar_lea.hbm %s3048_s9, 1024 }
 0x449   : > { %p2415_p7 = scmp.ne.s32.totalorder %s2921_s28, %s2414_s24  ;;  %p2419_p10 = scmp.lt.u32.totalorder %s2921_s28, %s3048_s9 }
 0x44a   : > { %p2420_p11 = scmp.lt.u32.totalorder %s2418_s21, %s2414_s24  ;;  %p2422_p13 = scmp.lt.u32.totalorder %s2414_s24, %s2921_s28 }
 0x44b   : > { %p2416_p8 = pnand %p2415_p7, %p2593_p5 }
 0x44c   : > { %p2421_p12 = por %p2420_p11, %p2419_p10 }
 0x44d   : > { %p2417_p9 = pneg %p2416_p8 }
 0x44e   : > { %p2423_p0 = por %p2422_p13, %p2421_p12 }
 0x450   : > { %p2424_p1 = pnand %p2423_p0, %p2417_p9 }
 0x452   : > { %2427 = shalt.err (!%p2424_p1)
}
 0x453   : > { %s2501_s16 = smov 128   ;;  %s2502_s23 = smov 256  }
 0x454   : > { %s2503_s14 = smov 8   ;;  %s3052_s26 = scalar_lea.sflag [#allocation5], %s2855_s22 }
 0x455   : > { %2318 = dma.vmem_to_hbm [thread:$0]  (%p2593_p5), %s2924_s29, 512, %s2921_s28, %s3052_s26, %s2501_s16, %s2502_s23, %s2503_s14  }
 0x456   : > { %s2112_s25 = sshll.u32 %s2855_s22, 3  ;;  %s3053_s14 = sshll.u32 %s2576_s13, 7 }
 0x457   : > { %s343_s28 = scalar_lea.vmem [#allocation2], %s2112_s25  ;;  %s2994_s21 = scalar_lea.hbm %s3047_s8, %s3053_s14 }
 0x458   : > { %s1990_s29 = sshll.u32 %s343_s28, 4  ;;  %s1972_s17 = scalar_lea.sflag [#allocation3], %s2855_s22  ;;  %s2996_s29 = int_to_ptr.vmem [resolvable:$true] %s1990_s29 }
 0x459   : > { %s2428_s16 = scalar_lea.vmem %s2996_s29, 128  ;;  %s2504_s13 = smov [#allocation2]  }
 0x45a   : > { %p2429_p2 = scmp.ne.s32.totalorder %s2996_s29, %s2428_s16  ;;  %s2432_s23 = sshll.u32 %s2504_s13, 4  ;;  %s2433_s23 = int_to_ptr.vmem [resolvable:$false] %s2432_s23 }
 0x45b   : > { %s2434_s26 = scalar_lea.vmem %s2433_s23, 256  ;;  %p2435_p7 = scmp.lt.s32.totalorder %s2996_s29, %s2433_s23 }
 0x45c   : > { %p2430_p3 = pnand %p2429_p2, %p2593_p5  ;;  %p2436_p8 = scmp.lt.s32.totalorder %s2434_s26, %s2428_s16 }
 0x45e   : > { %p2431_p4 = pneg %p2430_p3  ;;  %p2437_p9 = por %p2436_p8, %p2435_p7 }
 0x460   : > { %p2438_p10 = pnand %p2437_p9, %p2431_p4 }
 0x4e3   : > { %v2269_v42 = vpop.f32.mrb[16].mxu0 }
 0x4e4   : > { %v1867_v43 = vmul.f32 %v2269_v42, %v2739_v6  ;;  %v1787_v44 = vpop.f32.mrb[17].mxu0 }
 0x4e5   : > { %v1866_v45 = vmul.f32 %v1787_v44, %v2731_v61 }
 0x4e6   : > { %v1883_v47 = vsel %vm373_vm1, %v1867_v43, 0.0 }
 0x4e7   : > { %v1882_v58 = vsel %vm373_vm1, %v1866_v45, 0.0 }
 0x4e8   : > { %v1884_v48 = vadd.f32 %v1883_v47, %v1882_v58 }
 0x4e9   : > { %v2272_v49 = vpop.f32.mrb[18].mxu0 }
 0x4ea   : > { %v1885_v41 = vrot.slane %v1884_v48, 4  ;;  %v1869_v50 = vmul.f32 %v2272_v49, %v2751_v19  ;;  %v1797_v51 = vpop.f32.mrb[19].mxu0 }
 0x4eb   : > { %v1868_v56 = vmul.f32 %v1797_v51, %v2745_v13 }
 0x4ec   : > { %v1886_v54 = vadd.f32 %v1885_v41, %v1884_v48  ;;  %v1892_v57 = vsel %vm373_vm1, %v1869_v50, 0.0 }
 0x4ed   : > { %v1891_v6 = vsel %vm373_vm1, %v1868_v56, 0.0 }
 0x4ee   : > { %v1887_v59 = vrot.slane %v1886_v54, 2  ;;  %v1893_v60 = vadd.f32 %v1892_v57, %v1891_v6 }
 0x4f0   : > { %v1894_v61 = vrot.slane %v1893_v60, 4  ;;  %v1888_v0 = vadd.f32 %v1887_v59, %v1886_v54 }
 0x4f1   : > { %v2275_v62 = vpop.f32.mrb[20].mxu0 }
 0x4f2   : > { %v1895_v1 = vadd.f32 %v1894_v61, %v1893_v60  ;;  %v1871_v3 = vmul.f32 %v2275_v62, %v2762_v32  ;;  %v1807_v7 = vpop.f32.mrb[21].mxu0  ;;  %v1889_v9 = vrot.slane %v1888_v0, 1 }
 0x4f3   : > { %v1870_v8 = vmul.f32 %v1807_v7, %v2757_v25 }
 0x4f4   : > { %v1896_v19 = vrot.slane %v1895_v1, 2  ;;  %v1901_v2 = vsel %vm373_vm1, %v1871_v3, 0.0  ;;  %v1890_v16 = vadd.f32 %v1889_v9, %v1888_v0 }
 0x4f5   : > { %v1900_v13 = vsel %vm373_vm1, %v1870_v8, 0.0 }
 0x4f6   : > { %v1897_v53 = vadd.f32 %v1896_v19, %v1895_v1  ;;  %v1902_v12 = vadd.f32 %v1901_v2, %v1900_v13 }
 0x4f8   : > { %v1898_v14 = vrot.slane %v1897_v53, 1  ;;  %v1903_v10 = vrot.slane %v1902_v12, 4 }
 0x4f9   : > { %v2278_v15 = vpop.f32.mrb[22].mxu0 }
 0x4fa   : > { %v1899_v4 = vadd.f32 %v1898_v14, %v1897_v53  ;;  %v1904_v17 = vadd.f32 %v1903_v10, %v1902_v12  ;;  %v1873_v20 = vmul.f32 %v2278_v15, %v2775_v46  ;;  %v1817_v32 = vpop.f32.mrb[23].mxu0 }
 0x4fb   : > { %v1872_v21 = vmul.f32 %v1817_v32, %v2769_v39 }
 0x4fc   : > { %v1962_v25 = vsel %vm1349_vm13, %v1899_v4, %v1890_v16  ;;  %v1905_v22 = vrot.slane %v1904_v17, 2  ;;  %v1910_v23 = vsel %vm373_vm1, %v1873_v20, 0.0 }
 0x4fd   : > { %v1909_v24 = vsel %vm373_vm1, %v1872_v21, 0.0 }
 0x4fe   : > { %v1906_v27 = vadd.f32 %v1905_v22, %v1904_v17  ;;  %v1911_v28 = vadd.f32 %v1910_v23, %v1909_v24 }
 0x500   : > { %v1907_v29 = vrot.slane %v1906_v27, 1  ;;  %v1912_v30 = vrot.slane %v1911_v28, 4 }
 0x501   : > { %v2281_v31 = vpop.f32.mrb[24].mxu0 }
 0x502   : > { %v1908_v34 = vadd.f32 %v1907_v29, %v1906_v27  ;;  %v1913_v35 = vadd.f32 %v1912_v30, %v1911_v28  ;;  %v1875_v36 = vmul.f32 %v2281_v31, %v2787_v63  ;;  %v1827_v46 = vpop.f32.mrb[25].mxu0 }
 0x503   : > { %v1874_v37 = vmul.f32 %v1827_v46, %v2781_v55 }
 0x504   : > { %v1963_v39 = vsel %vm1352_vm11, %v1908_v34, %v1962_v25  ;;  %v1914_v40 = vrot.slane %v1913_v35, 2  ;;  %v1919_v52 = vsel %vm373_vm1, %v1875_v36, 0.0 }
 0x505   : > { %v1918_v42 = vsel %vm373_vm1, %v1874_v37, 0.0 }
 0x506   : > { %v1915_v43 = vadd.f32 %v1914_v40, %v1913_v35  ;;  %v1920_v44 = vadd.f32 %v1919_v52, %v1918_v42 }
 0x508   : > { %v1916_v45 = vrot.slane %v1915_v43, 1  ;;  %v1921_v47 = vrot.slane %v1920_v44, 4 }
 0x509   : > { %v2284_v58 = vpop.f32.mrb[26].mxu0 }
 0x50a   : > { %v1917_v48 = vadd.f32 %v1916_v45, %v1915_v43  ;;  %v1922_v41 = vadd.f32 %v1921_v47, %v1920_v44  ;;  %v1877_v49 = vmul.f32 %v2284_v58, %v2798_v11  ;;  %v1837_v63 = vpop.f32.mrb[27].mxu0 }
 0x50b   : > { %v1876_v50 = vmul.f32 %v1837_v63, %v2793_v5 }
 0x50c   : > { %v1964_v55 = vsel %vm1355_vm9, %v1917_v48, %v1963_v39  ;;  %v1923_v51 = vrot.slane %v1922_v41, 2  ;;  %v1928_v54 = vsel %vm373_vm1, %v1877_v49, 0.0 }
 0x50d   : > { %v1927_v56 = vsel %vm373_vm1, %v1876_v50, 0.0 }
 0x50e   : > { %v1924_v57 = vadd.f32 %v1923_v51, %v1922_v41  ;;  %v1929_v6 = vadd.f32 %v1928_v54, %v1927_v56 }
 0x510   : > { %v1925_v59 = vrot.slane %v1924_v57, 1  ;;  %v1930_v60 = vrot.slane %v1929_v6, 4 }
 0x511   : > { %v2287_v61 = vpop.f32.mrb[28].mxu0 }
 0x512   : > { %v1926_v62 = vadd.f32 %v1925_v59, %v1924_v57  ;;  %v1931_v0 = vadd.f32 %v1930_v60, %v1929_v6  ;;  %v1879_v1 = vmul.f32 %v2287_v61, %v2809_v26  ;;  %v1847_v11 = vpop.f32.mrb[29].mxu0 }
 0x513   : > { %v1878_v3 = vmul.f32 %v1847_v11, %v2804_v18 }
 0x514   : > { %v1932_v5 = vrot.slane %v1931_v0, 2  ;;  %v1937_v7 = vsel %vm373_vm1, %v1879_v1, 0.0  ;;  %v1965_v8 = vsel %vm1358_vm4, %v1926_v62, %v1964_v55 }
 0x515   : > { %v1936_v19 = vsel %vm373_vm1, %v1878_v3, 0.0 }
 0x516   : > { %v1933_v2 = vadd.f32 %v1932_v5, %v1931_v0  ;;  %v1938_v13 = vadd.f32 %v1937_v7, %v1936_v19 }
 0x518   : > { %v1934_v9 = vrot.slane %v1933_v2, 1  ;;  %v1939_v53 = vrot.slane %v1938_v13, 4 }
 0x519   : > { %v2290_v12 = vpop.f32.mrb[30].mxu0 }
 0x51a   : > { %v1935_v14 = vadd.f32 %v1934_v9, %v1933_v2  ;;  %v1940_v10 = vadd.f32 %v1939_v53, %v1938_v13  ;;  %v1881_v26 = vmul.f32 %v2290_v12, %v2820_v38  ;;  %v1857_v15 = vpop.f32.mrb[31].mxu0 }
 0x51b   : > { %v1880_v18 = vmul.f32 %v1857_v15, %v2815_v33 }
 0x51c   : > { %v1941_v16 = vrot.slane %v1940_v10, 2  ;;  %v1946_v4 = vsel %vm373_vm1, %v1881_v26, 0.0  ;;  %v1966_v17 = vsel %vm1361_vm5, %v1935_v14, %v1965_v8 }
 0x51d   : > { %v1945_v20 = vsel %vm373_vm1, %v1880_v18, 0.0 }
 0x51e   : > { %v1942_v32 = vadd.f32 %v1941_v16, %v1940_v10  ;;  %v1947_v21 = vadd.f32 %v1946_v4, %v1945_v20 }
 0x520   : > { %v1943_v25 = vrot.slane %v1942_v32, 1  ;;  %v1948_v22 = vrot.slane %v1947_v21, 4 }
 0x522   : > { %v1944_v23 = vadd.f32 %v1943_v25, %v1942_v32  ;;  %v1949_v24 = vadd.f32 %v1948_v22, %v1947_v21 }
 0x524   : > { %v1950_v38 = vrot.slane %v1949_v24, 2  ;;  %v1967_v33 = vsel %vm1364_vm6, %v1944_v23, %v1966_v17 }
 0x526   : > { %v1951_v27 = vadd.f32 %v1950_v38, %v1949_v24 }
 0x528   : > { %v1952_v28 = vrot.slane %v1951_v27, 1 }
 0x52a   : > { %v1953_v29 = vadd.f32 %v1952_v28, %v1951_v27 }
 0x52c   : > { %v1968_v30 = vsel %vm1367_vm7, %v1953_v29, %v1967_v33 }
 0x52d   : > { %1970 = vst.msk [vmem:[%s343_s28] sm:$0xff] %vm373_vm1, %v1968_v30 }
 0x52e   : > { %2441 = shalt.err (!%p2438_p10)
}
 0x52f   : > { %s2442_s22 = scalar_lea.hbm %s2994_s21, 128  ;;  %s2446_s14 = scalar_lea.hbm %s3047_s8, 256 }
 0x530   : > { %p2443_p11 = scmp.ne.s32.totalorder %s2994_s21, %s2442_s22  ;;  %p2447_p0 = scmp.lt.u32.totalorder %s2994_s21, %s3047_s8 }
 0x531   : > { %p2448_p1 = scmp.lt.u32.totalorder %s2446_s14, %s2442_s22  ;;  %p2450_p3 = scmp.lt.u32.totalorder %s2442_s22, %s2994_s21 }
 0x532   : > { %p2444_p12 = pnand %p2443_p11, %p2593_p5 }
 0x533   : > { %p2449_p2 = por %p2448_p1, %p2447_p0 }
 0x534   : > { %p2445_p13 = pneg %p2444_p12 }
 0x535   : > { %p2451_p4 = por %p2450_p3, %p2449_p2 }
 0x537   : > { %p2452_p7 = pnand %p2451_p4, %p2445_p13 }
 0x539   : > { %2455 = shalt.err (!%p2452_p7)
}
 0x53a   : > { %2317 = dma.vmem_to_hbm [thread:$0]  (%p2593_p5), %s2996_s29, 128, %s2994_s21, %s1972_s17  }
 0x53b PF: > { %p2328_p8 = scmp.ge.s32.totalorder %s2494_s12, 2  ;;  %s2017_s16 = sand.u32 1, %s2482_s30  }
 0x53c   : > { %s2018_s13 = scalar_lea.sflag [#allocation3], %s2017_s16 }
 0x53d   : > { %p2322_p9 = pnand %p2328_p8, %p2597_p6 }
 0x53f   : > { %2473 = dma.done.wait (!%p2322_p9), %s2018_s13, 128  }
 0x540   : > { %2475 = vsyncadd (!%p2322_p9), %s2018_s13, 4294967168  ;;  %s2027_s23 = scalar_lea.sflag [#allocation5], %s2017_s16 }
 0x541   : > { %2477 = dma.done.wait (!%p2322_p9), %s2027_s23, 512  }
 0x542   : > { %2479 = vsyncadd (!%p2322_p9), %s2027_s23, 4294966784  ;;  %p23_p5 = scmp.ge.s32.totalorder %s2580_s15, 4   ;;  %s3054_s30 = smov %s2486_s10 }
 0x543   : > { %s3055_s10 = smov %s2490_s11  ;;  %s3056_s11 = smov %s2591_s18 }
 0x544   : > { %s3057_s12 = smov %s2580_s15  ;;  %25 = sbr.rel (!%p23_p5) target bundleno = 5 (0x5), region = 110 }
 0x54b   :  { %2032 = vsyncpa [#allocation3], 1 }
 0x54c   :  { %2034 = vsyncpa [#allocation3 + $0x1], 1 }
 0x54d   :  { %2035 = vsyncpa [#allocation5], 1 }
 0x54e   :  { %2037 = vsyncpa [#allocation5 + $0x1], 1 }

</bundles_post_ra>
